<compile_context>
chip_gen: v5e
topology: v5e:2x2
jax: 0.10.0
libtpu: 0.0.40
codegen_flags: <defaults>
</compile_context>

<pallas_src>
import functools

import jax
import jax.numpy as jnp
from jax.experimental import pallas as pl
from jax.experimental.pallas import tpu as pltpu

_VMEM_LIMIT = 48 * 1024 * 1024


# ------------------ fused LayerNorm + dual projection (qk & v) ------------------

def _ln_dualproj_kernel(x_ref, g_ref, b_ref, wqk_ref, wv_ref, qk_ref, v_ref, *, eps):
    f32 = jnp.float32
    x = x_ref[...].astype(f32)                               # (TM, D)
    mean = jnp.mean(x, axis=-1, keepdims=True)
    xc = x - mean
    var = jnp.mean(xc * xc, axis=-1, keepdims=True)
    xn = xc * jax.lax.rsqrt(var + eps)
    xn = xn * g_ref[...].astype(f32) + b_ref[...].astype(f32)
    xb = xn.astype(jnp.bfloat16)                             # bf16 MXU operand
    # two bias-free projections off the same normalized activations (kept in
    # vregs); separate full-width output blocks -> lane-dense, unmasked stores.
    qk_ref[...] = jnp.dot(xb, wqk_ref[...],
                          preferred_element_type=f32).astype(qk_ref.dtype)
    v_ref[...] = jnp.dot(xb, wv_ref[...],
                         preferred_element_type=f32).astype(v_ref.dtype)


def ln_dualproj(x2d, gamma, beta, w_qk_t, w_v_t, *, eps=1e-5, row_tile=1024):
    """LayerNorm(x) @ W_qk^T, LayerNorm(x) @ W_v^T -> (qk, v) in bf16, (M, inner)."""
    M, D = x2d.shape
    inner = w_qk_t.shape[1]
    tm = M if M <= row_tile else row_tile        # row_tile is a multiple of 8
    grid = (pl.cdiv(M, tm),)
    qk, v = pl.pallas_call(
        functools.partial(_ln_dualproj_kernel, eps=eps),
        grid=grid,
        out_shape=(jax.ShapeDtypeStruct((M, inner), jnp.bfloat16),
                   jax.ShapeDtypeStruct((M, inner), jnp.bfloat16)),
        in_specs=[
            pl.BlockSpec((tm, D), lambda i: (i, 0)),
            pl.BlockSpec((1, D), lambda i: (0, 0)),
            pl.BlockSpec((1, D), lambda i: (0, 0)),
            pl.BlockSpec((D, inner), lambda i: (0, 0)),
            pl.BlockSpec((D, inner), lambda i: (0, 0)),
        ],
        out_specs=(pl.BlockSpec((tm, inner), lambda i: (i, 0)),
                   pl.BlockSpec((tm, inner), lambda i: (i, 0))),
        compiler_params=pltpu.CompilerParams(
            dimension_semantics=("parallel",),
            vmem_limit_bytes=_VMEM_LIMIT),
    )(x2d, gamma.reshape(1, D), beta.reshape(1, D), w_qk_t, w_v_t)
    return qk, v


# --------------- flash attention + fused output projection (one direction) ------

def _flash_proj_kernel(q_ref, k_ref, v_ref, w_ref, b_ref, o_ref,
                       m_ref, l_ref, acc_ref,
                       *, heads, dim_head, k_len, block_k, mask_k):
    f32 = jnp.float32
    kt = pl.program_id(2)

    @pl.when(kt == 0)
    def _init():
        m_ref[...] = jnp.full(m_ref.shape, -jnp.inf, f32)
        l_ref[...] = jnp.zeros(l_ref.shape, f32)
        acc_ref[...] = jnp.zeros(acc_ref.shape, f32)

    q = q_ref[...]                               # (tq, inner) bf16 (scale folded)
    k = k_ref[...]                               # (tk, inner) bf16
    v = v_ref[...]                               # (tk, inner) bf16
    tq, tk = q.shape[0], k.shape[0]

    if mask_k:                                   # only emitted for ragged K tiles
        col = jax.lax.broadcasted_iota(jnp.int32, (tq, tk), 1)
        valid = (kt * block_k + col) < k_len

    # heads are static column windows of the lane-dense (N, H*Dh) slabs -- no
    # (B,H,N,Dh) transposes anywhere.
    for h in range(heads):
        lo = h * dim_head
        qh = q[:, lo:lo + dim_head]              # (tq, Dh)
        kh = k[:, lo:lo + dim_head]              # (tk, Dh)
        vh = v[:, lo:lo + dim_head]              # (tk, Dh)

        # scores on the MXU: contract the Dh (last) dims of both operands.
        s = jax.lax.dot_general(qh, kh, (((1,), (1,)), ((), ())),
                                preferred_element_type=f32)   # (tq, tk) f32
        if mask_k:
            s = jnp.where(valid, s, -jnp.inf)

        m_prev = m_ref[h]                                     # (tq, 1) f32
        m_new = jnp.maximum(m_prev, jnp.max(s, axis=-1, keepdims=True))
        alpha = jnp.exp(m_prev - m_new)                       # (tq, 1)
        p = jnp.exp(s - m_new)                                # (tq, tk) f32
        l_ref[h] = alpha * l_ref[h] + jnp.sum(p, axis=-1, keepdims=True)
        pv = jnp.dot(p.astype(v.dtype), vh,
                     preferred_element_type=f32)              # (tq, Dh) f32
        acc_ref[h] = alpha * acc_ref[h] + pv                  # unnormalized acc
        m_ref[h] = m_new

    @pl.when(kt == pl.num_programs(2) - 1)
    def _finalize():
        # post-matmul softmax normalization + per-head output projection, summed
        # against sublane-aligned weight row windows (no head-merge transpose).
        y = jnp.zeros((q_ref.shape[0], w_ref.shape[1]), f32)
        for h in range(heads):
            lo = h * dim_head
            o_h = acc_ref[h] * pl.reciprocal(l_ref[h], approx=True)   # (tq, Dh)
            y = y + jnp.dot(o_h.astype(w_ref.dtype), w_ref[lo:lo + dim_head, :],
                            preferred_element_type=f32)
        y = y + b_ref[...].astype(f32)
        o_ref[...] = y.astype(o_ref.dtype)


def flash_attn_proj(q, k, v, w_t, bias, *, heads, dim_head,
                    q_tile=256, k_tile=256, out_dtype=jnp.float32):
    """softmax_j(q @ k^T per head) @ v  ->  merge heads -> @ w_t + bias."""
    B, Lq, inner = q.shape
    Lk = k.shape[1]
    out_dim = w_t.shape[1]
    tq = Lq if Lq <= q_tile else q_tile
    tk = Lk if Lk <= k_tile else k_tile
    grid = (B, pl.cdiv(Lq, tq), pl.cdiv(Lk, tk))
    kern = functools.partial(_flash_proj_kernel, heads=heads, dim_head=dim_head,
                             k_len=Lk, block_k=tk, mask_k=(Lk % tk != 0))
    return pl.pallas_call(
        kern,
        grid=grid,
        out_shape=jax.ShapeDtypeStruct((B, Lq, out_dim), out_dtype),
        in_specs=[
            pl.BlockSpec((None, tq, inner), lambda b, qi, ki: (b, qi, 0)),
            pl.BlockSpec((None, tk, inner), lambda b, qi, ki: (b, ki, 0)),
            pl.BlockSpec((None, tk, inner), lambda b, qi, ki: (b, ki, 0)),
            pl.BlockSpec((inner, out_dim), lambda b, qi, ki: (0, 0)),
            pl.BlockSpec((1, out_dim), lambda b, qi, ki: (0, 0)),
        ],
        out_specs=pl.BlockSpec((None, tq, out_dim), lambda b, qi, ki: (b, qi, 0)),
        scratch_shapes=[
            pltpu.VMEM((heads, tq, 1), jnp.float32),          # running max
            pltpu.VMEM((heads, tq, 1), jnp.float32),          # running sum
            pltpu.VMEM((heads, tq, dim_head), jnp.float32),   # unnormalized PV acc
        ],
        compiler_params=pltpu.CompilerParams(
            dimension_semantics=("parallel", "parallel", "arbitrary"),
            vmem_limit_bytes=_VMEM_LIMIT),
    )(q, k, v, w_t, bias)


# --------------------------------- module wrapper --------------------------------

def init_params(key, dim, context_dim, heads, dim_head):
    inner = heads * dim_head
    scale = float(dim_head) ** -0.5
    ks = jax.random.split(key, 8)
    s = 0.05
    w_qk = s * jax.random.normal(ks[0], (inner, dim), jnp.float32)
    w_cqk = s * jax.random.normal(ks[1], (inner, context_dim), jnp.float32)
    w_v = s * jax.random.normal(ks[2], (inner, dim), jnp.float32)
    w_cv = s * jax.random.normal(ks[3], (inner, context_dim), jnp.float32)
    w_out = s * jax.random.normal(ks[4], (dim, inner), jnp.float32)
    b_out = s * jax.random.normal(ks[5], (dim,), jnp.float32)
    w_cout = s * jax.random.normal(ks[6], (context_dim, inner), jnp.float32)
    b_cout = s * jax.random.normal(ks[7], (context_dim,), jnp.float32)
    return {
        "heads": heads, "dim_head": dim_head,
        "ln_g": jnp.ones((dim,), jnp.float32),
        "ln_b": jnp.zeros((dim,), jnp.float32),
        "cln_g": jnp.ones((context_dim,), jnp.float32),
        "cln_b": jnp.zeros((context_dim,), jnp.float32),
        # torch-convention f32 weights (kept only for the pure-JAX reference)
        "w_qk": w_qk, "w_cqk": w_cqk, "w_v": w_v, "w_cv": w_cv,
        "w_out": w_out, "b_out": b_out, "w_cout": w_cout, "b_cout": b_cout,
        # kernel layout: transposed, bf16, softmax scale folded into the x-side qk
        # weight -- all done ONCE at init, never on the hot path.
        "w_qk_x_t": (w_qk.T * scale).astype(jnp.bfloat16),   # (dim,  inner)
        "w_v_x_t": w_v.T.astype(jnp.bfloat16),               # (dim,  inner)
        "w_qk_c_t": w_cqk.T.astype(jnp.bfloat16),            # (cdim, inner)
        "w_v_c_t": w_cv.T.astype(jnp.bfloat16),              # (cdim, inner)
        "w_out_t": w_out.T.astype(jnp.bfloat16),             # (inner, dim)
        "w_cout_t": w_cout.T.astype(jnp.bfloat16),           # (inner, cdim)
    }


def bidirectional_cross_attention(params, x, context):
    B, I, dim = x.shape
    J, cdim = context.shape[1], context.shape[2]
    h, dh = params["heads"], params["dim_head"]
    inner = h * dh

    # fused prenorm + bias-free {qk, v} projections (one kernel per input stream);
    # bf16 intermediates halve the HBM glue traffic between kernels.
    qk, v = ln_dualproj(x.reshape(B * I, dim), params["ln_g"], params["ln_b"],
                        params["w_qk_x_t"], params["w_v_x_t"])
    cqk, cv = ln_dualproj(context.reshape(B * J, cdim), params["cln_g"],
                          params["cln_b"], params["w_qk_c_t"], params["w_v_c_t"])
    qk = qk.reshape(B, I, inner)
    v = v.reshape(B, I, inner)
    cqk = cqk.reshape(B, J, inner)
    cv = cv.reshape(B, J, inner)

    # dropout(p=0) / talking_heads=False / mask=None / rel_pos_bias=False: no-ops.
    # out  : softmax over j (rows of sim)  -> flash pass with context as K/V.
    out = flash_attn_proj(qk, cqk, cv, params["w_out_t"],
                          params["b_out"].reshape(1, dim),
                          heads=h, dim_head=dh, out_dtype=x.dtype)
    # cout : softmax over i (cols of sim) == rows of sim^T, which the second flash
    #        pass produces directly on the MXU (Q=cqk, K=qk_x_scaled, V=v).
    cout = flash_attn_proj(cqk, qk, v, params["w_cout_t"],
                           params["b_cout"].reshape(1, cdim),
                           heads=h, dim_head=dh, out_dtype=x.dtype)
    return out, cout


# -------------------------------- pure-JAX reference -------------------------------

def reference(params, x, context):
    def ln(t, g, b, eps=1e-5):
        m = jnp.mean(t, axis=-1, keepdims=True)
        var = jnp.mean((t - m) ** 2, axis=-1, keepdims=True)
        return (t - m) * jax.lax.rsqrt(var + eps) * g + b

    B, I, dim = x.shape
    J = context.shape[1]
    h, dh = params["heads"], params["dim_head"]
    scale = float(dh) ** -0.5

    xn = ln(x, params["ln_g"], params["ln_b"])
    cn = ln(context, params["cln_g"], params["cln_b"])

    def proj(t, w):
        return jnp.einsum("bnd,od->bno", t, w)

    def split(t, n):
        return t.reshape(B, n, h, dh).transpose(0, 2, 1, 3)

    qk, v = split(proj(xn, params["w_qk"]), I), split(proj(xn, params["w_v"]), I)
    cqk, cv = split(proj(cn, params["w_cqk"]), J), split(proj(cn, params["w_cv"]), J)

    sim = jnp.einsum("bhid,bhjd->bhij", qk, cqk) * scale
    attn = jax.nn.softmax(sim - jnp.max(sim, axis=-1, keepdims=True), axis=-1)
    cattn = jax.nn.softmax(sim - jnp.max(sim, axis=-2, keepdims=True), axis=-2)

    out = jnp.einsum("bhij,bhjd->bhid", attn, cv)
    cout = jnp.einsum("bhji,bhjd->bhid", cattn, v)

    out = out.transpose(0, 2, 1, 3).reshape(B, I, h * dh)
    cout = cout.transpose(0, 2, 1, 3).reshape(B, J, h * dh)
    out = jnp.einsum("bno,do->bnd", out, params["w_out"]) + params["b_out"]
    cout = jnp.einsum("bno,do->bnd", cout, params["w_cout"]) + params["b_cout"]
    return out, cout


# -------------------------------------- main ---------------------------------------

if __name__ == "__main__":
    B, I, J = 2, 8, 16
    dim, context_dim = 32, 48
    heads, dim_head = 2, 16

    key = jax.random.PRNGKey(0)
    kx, kc, kp = jax.random.split(key, 3)
    x = jax.random.normal(kx, (B, I, dim), jnp.float32)
    context = jax.random.normal(kc, (B, J, context_dim), jnp.float32)
    params = init_params(kp, dim, context_dim, heads, dim_head)

    out, cout = bidirectional_cross_attention(params, x, context)
    out = jax.block_until_ready(out)
    cout = jax.block_until_ready(cout)

    ref_out, ref_cout = reference(params, x, context)
    assert out.shape == (B, I, dim) and cout.shape == (B, J, context_dim)
    # bf16 MXU path + approx-EUP softmax reciprocal vs f32 reference -> loose tol
    assert jnp.allclose(out, ref_out, rtol=1e-2, atol=1e-2), "out mismatch"
    assert jnp.allclose(cout, ref_cout, rtol=1e-2, atol=1e-2), "context_out mismatch"

    print("KERNEL_OK")
</pallas_src>

<mosaic_0001>
module attributes {stable_mosaic.version = 11 : i64} {
  func.func @_ln_dualproj_kernel(%arg0: i32, %arg1: memref<16x32xf32, #tpu.memory_space<vmem>>, %arg2: memref<1x32xf32, #tpu.memory_space<vmem>>, %arg3: memref<1x32xf32, #tpu.memory_space<vmem>>, %arg4: memref<32x32xbf16, #tpu.memory_space<vmem>>, %arg5: memref<32x32xbf16, #tpu.memory_space<vmem>>, %arg6: memref<16x32xbf16, #tpu.memory_space<vmem>>, %arg7: memref<16x32xbf16, #tpu.memory_space<vmem>>) attributes {dimension_semantics = [#tpu.dimension_semantics<parallel>], iteration_bounds = array<i64: 1>, scalar_prefetch = 0 : i64, scratch_operands = 0 : i64, tpu.core_type = #tpu.core_type<tc>, window_params = [{transform_indices = @transform_0, window_bounds = array<i64: 16, 32>}, {pipeline_mode = #tpu.pipeline_mode<synchronous>, transform_indices = @transform_1, window_bounds = array<i64: 1, 32>}, {pipeline_mode = #tpu.pipeline_mode<synchronous>, transform_indices = @transform_2, window_bounds = array<i64: 1, 32>}, {pipeline_mode = #tpu.pipeline_mode<synchronous>, transform_indices = @transform_3, window_bounds = array<i64: 32, 32>}, {pipeline_mode = #tpu.pipeline_mode<synchronous>, transform_indices = @transform_4, window_bounds = array<i64: 32, 32>}, {transform_indices = @transform_5, window_bounds = array<i64: 16, 32>}, {transform_indices = @transform_6, window_bounds = array<i64: 16, 32>}]} {
    %c0 = arith.constant 0 : index
    %c0_0 = arith.constant 0 : index
    %0 = vector.load %arg1[%c0, %c0_0] : memref<16x32xf32, #tpu.memory_space<vmem>>, vector<16x32xf32>
    %cst = arith.constant dense<0.000000e+00> : vector<16xf32>
    %1 = vector.multi_reduction <add>, %0, %cst [1] : vector<16x32xf32> to vector<16xf32>
    %2 = vector.shape_cast %1 : vector<16xf32> to vector<16x1xf32>
    %cst_1 = arith.constant 3.200000e+01 : f32
    %3 = vector.broadcast %cst_1 : f32 to vector<16x1xf32>
    %4 = arith.divf %2, %3 : vector<16x1xf32>
    %5 = vector.broadcast %4 : vector<16x1xf32> to vector<16x32xf32>
    %6 = arith.subf %0, %5 : vector<16x32xf32>
    %7 = arith.mulf %6, %6 : vector<16x32xf32>
    %cst_2 = arith.constant dense<0.000000e+00> : vector<16xf32>
    %8 = vector.multi_reduction <add>, %7, %cst_2 [1] : vector<16x32xf32> to vector<16xf32>
    %9 = vector.shape_cast %8 : vector<16xf32> to vector<16x1xf32>
    %cst_3 = arith.constant 3.200000e+01 : f32
    %10 = vector.broadcast %cst_3 : f32 to vector<16x1xf32>
    %11 = arith.divf %9, %10 : vector<16x1xf32>
    %cst_4 = arith.constant 9.99999974E-6 : f32
    %12 = vector.broadcast %cst_4 : f32 to vector<16x1xf32>
    %13 = arith.addf %11, %12 : vector<16x1xf32>
    %14 = math.rsqrt %13 : vector<16x1xf32>
    %15 = vector.broadcast %14 : vector<16x1xf32> to vector<16x32xf32>
    %16 = arith.mulf %6, %15 : vector<16x32xf32>
    %c0_5 = arith.constant 0 : index
    %c0_6 = arith.constant 0 : index
    %17 = vector.load %arg2[%c0_5, %c0_6] : memref<1x32xf32, #tpu.memory_space<vmem>>, vector<1x32xf32>
    %18 = vector.broadcast %17 : vector<1x32xf32> to vector<16x32xf32>
    %19 = arith.mulf %16, %18 : vector<16x32xf32>
    %c0_7 = arith.constant 0 : index
    %c0_8 = arith.constant 0 : index
    %20 = vector.load %arg3[%c0_7, %c0_8] : memref<1x32xf32, #tpu.memory_space<vmem>>, vector<1x32xf32>
    %21 = vector.broadcast %20 : vector<1x32xf32> to vector<16x32xf32>
    %22 = arith.addf %19, %21 : vector<16x32xf32>
    %23 = arith.truncf %22 : vector<16x32xf32> to vector<16x32xbf16>
    %c0_9 = arith.constant 0 : index
    %c0_10 = arith.constant 0 : index
    %24 = vector.load %arg4[%c0_9, %c0_10] : memref<32x32xbf16, #tpu.memory_space<vmem>>, vector<32x32xbf16>
    %cst_11 = arith.constant dense<0.000000e+00> : vector<16x32xf32>
    %25 = tpu.matmul %23, %24, %cst_11 {dimension_numbers = #tpu.dot_dimension_numbers<[1], [0], [0], [1], [0, 0, 1, 1], [], []>} : vector<16x32xbf16>, vector<32x32xbf16>, vector<16x32xf32> -> vector<16x32xf32>
    %26 = arith.truncf %25 : vector<16x32xf32> to vector<16x32xbf16>
    %c0_12 = arith.constant 0 : index
    %c0_13 = arith.constant 0 : index
    %27 = vector.load %arg6[%c0_12, %c0_13] : memref<16x32xbf16, #tpu.memory_space<vmem>>, vector<16x32xbf16>
    tpu.vector_store %arg6[%c0_12, %c0_13], %26 {strides = array<i32>} : memref<16x32xbf16, #tpu.memory_space<vmem>>, vector<16x32xbf16>,
    %c0_14 = arith.constant 0 : index
    %c0_15 = arith.constant 0 : index
    %28 = vector.load %arg5[%c0_14, %c0_15] : memref<32x32xbf16, #tpu.memory_space<vmem>>, vector<32x32xbf16>
    %cst_16 = arith.constant dense<0.000000e+00> : vector<16x32xf32>
    %29 = tpu.matmul %23, %28, %cst_16 {dimension_numbers = #tpu.dot_dimension_numbers<[1], [0], [0], [1], [0, 0, 1, 1], [], []>} : vector<16x32xbf16>, vector<32x32xbf16>, vector<16x32xf32> -> vector<16x32xf32>
    %30 = arith.truncf %29 : vector<16x32xf32> to vector<16x32xbf16>
    %c0_17 = arith.constant 0 : index
    %c0_18 = arith.constant 0 : index
    %31 = vector.load %arg7[%c0_17, %c0_18] : memref<16x32xbf16, #tpu.memory_space<vmem>>, vector<16x32xbf16>
    tpu.vector_store %arg7[%c0_17, %c0_18], %30 {strides = array<i32>} : memref<16x32xbf16, #tpu.memory_space<vmem>>, vector<16x32xbf16>,
    return
  }
  func.func @transform_0(%arg0: i32) -> (i32, i32) {
    %c0_i32 = arith.constant 0 : i32
    %c0_i32_0 = arith.constant 0 : i32
    return %arg0, %c0_i32 : i32, i32
  }
  func.func @transform_1(%arg0: i32) -> (i32, i32) {
    %c0_i32 = arith.constant 0 : i32
    %c0_i32_0 = arith.constant 0 : i32
    %c0_i32_1 = arith.constant 0 : i32
    return %c0_i32, %c0_i32_0 : i32, i32
  }
  func.func @transform_2(%arg0: i32) -> (i32, i32) {
    %c0_i32 = arith.constant 0 : i32
    %c0_i32_0 = arith.constant 0 : i32
    %c0_i32_1 = arith.constant 0 : i32
    return %c0_i32, %c0_i32_0 : i32, i32
  }
  func.func @transform_3(%arg0: i32) -> (i32, i32) {
    %c0_i32 = arith.constant 0 : i32
    %c0_i32_0 = arith.constant 0 : i32
    %c0_i32_1 = arith.constant 0 : i32
    return %c0_i32, %c0_i32_0 : i32, i32
  }
  func.func @transform_4(%arg0: i32) -> (i32, i32) {
    %c0_i32 = arith.constant 0 : i32
    %c0_i32_0 = arith.constant 0 : i32
    %c0_i32_1 = arith.constant 0 : i32
    return %c0_i32, %c0_i32_0 : i32, i32
  }
  func.func @transform_5(%arg0: i32) -> (i32, i32) {
    %c0_i32 = arith.constant 0 : i32
    %c0_i32_0 = arith.constant 0 : i32
    return %arg0, %c0_i32 : i32, i32
  }
  func.func @transform_6(%arg0: i32) -> (i32, i32) {
    %c0_i32 = arith.constant 0 : i32
    %c0_i32_0 = arith.constant 0 : i32
    return %arg0, %c0_i32 : i32, i32
  }
}

</mosaic_0001>

<bundles_post_ra>
// kernel: tpu_custom_call.1
= control target key start
LH: loop header
LB: loop body
LE: loop exit
PB: predicated region body
PF: predicated region fallthrough
CT: control target
= control target key end

     0   :  { %12 = vsyncpa [#allocation3], 0  ;;  %s548_s0 = inlined_call_operand.hbm [shape: f32[16,32], index: 0, kind: input, shape index: {}]   ;;  %s549_s1 = inlined_call_operand.hbm [shape: f32[1,32], index: 1, kind: input, shape index: {}]   ;;  %s550_s2 = inlined_call_operand.vmem [shape: f32[1,32], index: 2, kind: input, shape index: {}]   ;;  %s551_s3 = inlined_call_operand.hbm [shape: bf16[32,32], index: 3, kind: input, shape index: {}]   ;;  %s552_s4 = inlined_call_operand.hbm [shape: bf16[32,32], index: 4, kind: input, shape index: {}]   ;;  %s553_s5 = inlined_call_operand.hbm [shape: bf16[16,32], index: 5, kind: output, shape index: {0}]   ;;  %s554_s6 = inlined_call_operand.hbm [shape: bf16[16,32], index: 6, kind: output, shape index: {1}]  }
   0x1   :  { %13 = vsyncpa [#allocation6], 0 }
   0x2   :  { %14 = vsyncpa [#allocation9], 0 }
   0x3   :  { %15 = vsyncpa [#allocation4], 0  ;;  %s35_s23 = sshll.u32 %s549_s1, 4  ;;  %s36_s23 = int_to_ptr.hbm [resolvable:$true] %s35_s23 }
   0x4   :  { %16 = vsyncpa [#allocation12], 0  ;;  %s459_s24 = smov [#allocation5]   ;;  %s21_s28 = sshll.u32 %s548_s0, 4  ;;  %s22_s28 = int_to_ptr.hbm [resolvable:$true] %s21_s28 }
   0x5   :  { %s37_s25 = sshll.u32 %s459_s24, 4  ;;  %s460_s29 = smov [#allocation2]   ;;  %s38_s25 = int_to_ptr.vmem [resolvable:$true] %s37_s25 }
   0x6   :  { %40 = dma.hbm_to_vmem [thread:$0]  %s36_s23, 16, %s38_s25, [#allocation6]  }
   0x7   :  { %s23_s30 = sshll.u32 %s460_s29, 4  ;;  %s461_s7 = smov 128   ;;  %s24_s30 = int_to_ptr.vmem [resolvable:$true] %s23_s30 }
   0x8   :  { %s462_s8 = smov 8   ;;  %s47_s1 = sshll.u32 %s551_s3, 4  ;;  %s48_s1 = int_to_ptr.hbm [resolvable:$true] %s47_s1 }
   0x9   :  { %29 = dma.hbm_to_vmem [thread:$0]  %s22_s28, 256, %s24_s30, [#allocation3], %s461_s7, %s461_s7, %s462_s8  }
   0xa   :  { %s463_s11 = smov [#allocation7]   ;;  %s60_s0 = sshll.u32 %s552_s4, 4  ;;  %s61_s0 = int_to_ptr.hbm [resolvable:$true] %s60_s0 }
   0xb   :  { %s49_s12 = sshll.u32 %s463_s11, 4  ;;  %s464_s15 = smov 64   ;;  %s50_s12 = int_to_ptr.vmem [resolvable:$true] %s49_s12 }
   0xc   :  { %s465_s16 = smov 4   ;;  %s466_s17 = smov [#allocation8]  }
   0xd   :  { %55 = dma.hbm_to_vmem [thread:$0]  %s48_s1, 256, %s50_s12, [#allocation6], %s464_s15, %s464_s15, %s465_s16  }
   0xe   :  { %s62_s18 = sshll.u32 %s466_s17, 4  ;;  %s63_s18 = int_to_ptr.vmem [resolvable:$true] %s62_s18 }
   0xf   :  { %68 = dma.hbm_to_vmem [thread:$0]  %s61_s0, 256, %s63_s18, [#allocation9], %s464_s15, %s464_s15, %s465_s16  }
  0x10   :  { %449 = dma.done.wait [#allocation3], 256  }
  0x11   :  { %450 = vsyncadd [#allocation3], 4294967040 }
  0x12   :  { %451 = dma.done.wait [#allocation6], 272  }
  0x13   :  { %452 = vsyncadd [#allocation6], 4294967024 }
  0x14   :  { %453 = dma.done.wait [#allocation9], 256  }
  0x15   :  { %454 = vsyncadd [#allocation9], 4294967040  ;;  %vm88_vm0 = vcmask 261120   ;;  %v86_v0 = vld [vmem:[#allocation2] sm:$0xff]  ;;  %v87_v2 = vld [vmem:[#allocation2 + $0x8] sm:$0xff]  ;;  %v467_v4 = vmov 32.0  }
  0x16   :  { %v89_v1 = vsel %vm88_vm0, %v86_v0, 0.0  ;;  %v92_v3 = vsel %vm88_vm0, %v87_v2, 0.0  ;;  %299 = vrcp.f32 %v467_v4  ;;  %v283_v21 = vld [vmem:[#allocation7 + $0x8] sm:$0xff]  ;;  %v285_v22 = vld [vmem:[#allocation8 + $0x8] sm:$0xff]  ;;  %v282_v24 = vld [vmem:[#allocation7] sm:$0xff]  ;;  %vm188_vm8 = vcmask 257024  }
  0x17   :  { %90 = vadd.xlane.f32.xlu0 %v89_v1  ;;  %178 = vmatpush.bf16.msra.mxu0 %v283_v21  ;;  %v284_v25 = vld [vmem:[#allocation8] sm:$0xff]  ;;  %v297_v44 = vld [vmem:[#allocation5] ss:$0 sm:$0xff]  ;;  %v298_v49 = vld [vmem:[%s550_s2] ss:$0 sm:$0xff]  ;;  %s468_s19 = smov [#allocation10]  }
  0x18   :  { %213 = vmatpush.bf16.msra.mxu1 %v285_v22  ;;  %s229_s20 = sshll.u32 %s468_s19, 4  ;;  %s231_s22 = sshll.u32 %s553_s5, 4  ;;  %s230_s20 = int_to_ptr.vmem [resolvable:$true] %s229_s20  ;;  %s232_s22 = int_to_ptr.hbm [resolvable:$true] %s231_s22 }
  0x19   :  { %s469_s23 = smov [#allocation11]   ;;  %s244_s27 = sshll.u32 %s554_s6, 4  ;;  %s245_s27 = int_to_ptr.hbm [resolvable:$true] %s244_s27 }
  0x1a   :  { %s242_s24 = sshll.u32 %s469_s23, 4  ;;  %s243_s24 = int_to_ptr.vmem [resolvable:$true] %s242_s24 }
  0x1b   :  { %179 = vmatpush.bf16.msra.mxu0 %v282_v24 }
  0x1c   :  { %v300_v5 = vpop.eup %299  ;;  %214 = vmatpush.bf16.msra.mxu1 %v284_v25 }
  0x1d   :  { %v96_v6 = vmul.f32 32.0, %v300_v5  ;;  %vm100_vm1 = vweird.f32 %v300_v5 }
  0x1f   :  { %93 = vadd.xlane.f32.xlu0 %v92_v3  ;;  %v97_v7 = vsub.f32 1.0, %v96_v6 }
  0x21   :  { %v98_v8 = vmul.f32 %v300_v5, %v97_v7 }
  0x23   :  { %v99_v9 = vadd.f32 %v300_v5, %v98_v8 }
  0x25   :  { %v101_v10 = vsel %vm100_vm1, %v300_v5, %v99_v9 }
  0x8a   :  { %v91_v11 = vpop.xlane.xlu0 %90 }
  0x8b   :  { %v102_v12 = vmul.f32 %v101_v10, %v91_v11 }
  0x8d   :  { %v104_v13 = vsub.f32 %v86_v0, %v102_v12 }
  0x8f   :  { %v106_v14 = vmul.f32 %v104_v13, %v104_v13 }
  0x91   :  { %v108_v15 = vsel %vm88_vm0, %v106_v14, 0.0 }
  0x92   :  { %109 = vadd.xlane.f32.xlu1 %v108_v15  ;;  %v94_v16 = vpop.xlane.xlu0 %93 }
  0x93   :  { %v103_v17 = vmul.f32 %v101_v10, %v94_v16 }
  0x95   :  { %v105_v18 = vsub.f32 %v87_v2, %v103_v17 }
  0x97   :  { %v107_v19 = vmul.f32 %v105_v18, %v105_v18 }
  0x99   :  { %v111_v20 = vsel %vm88_vm0, %v107_v19, 0.0 }
  0x9a   :  { %112 = vadd.xlane.f32.xlu1 %v111_v20 }
 0x105   :  { %v110_v23 = vpop.xlane.xlu1 %109 }
 0x106   :  { %v114_v26 = vmul.f32 %v110_v23, %v101_v10 }
 0x108   :  { %v116_v27 = vadd.f32 1e-05, %v114_v26 }
 0x10a   :  { %301 = vrsqrt.f32 %v116_v27  ;;  %vm124_vm3 = vweird.f32 %v116_v27 }
 0x10d   :  { %v113_v28 = vpop.xlane.xlu1 %112 }
 0x10e   :  { %v115_v29 = vmul.f32 %v113_v28, %v101_v10 }
 0x110   :  { %v302_v30 = vpop.eup %301  ;;  %v117_v31 = vadd.f32 1e-05, %v115_v29 }
 0x111   :  { %v119_v32 = vmul.f32 %v302_v30, %v116_v27  ;;  %vm125_vm2 = vweird.f32 %v302_v30 }
 0x112   :  { %303 = vrsqrt.f32 %v117_v31  ;;  %vm126_vm4 = vmor %vm124_vm3, %vm125_vm2  ;;  %vm134_vm6 = vweird.f32 %v117_v31 }
 0x113   :  { %v120_v33 = vmul.f32 %v302_v30, %v119_v32 }
 0x115   :  { %v121_v34 = vmul.f32 0.5, %v120_v33 }
 0x117   :  { %v122_v35 = vsub.f32 1.5, %v121_v34 }
 0x118   :  { %v304_v36 = vpop.eup %303 }
 0x119   :  { %v123_v37 = vmul.f32 %v302_v30, %v122_v35  ;;  %v129_v38 = vmul.f32 %v304_v36, %v117_v31  ;;  %vm135_vm5 = vweird.f32 %v304_v36 }
 0x11a   :  { %vm136_vm7 = vmor %vm134_vm6, %vm135_vm5 }
 0x11b   :  { %v130_v39 = vmul.f32 %v304_v36, %v129_v38  ;;  %v127_v40 = vsel %vm126_vm4, %v302_v30, %v123_v37 }
 0x11c   :  { %v138_v43 = vmul.f32 %v127_v40, %v104_v13 }
 0x11d   :  { %v131_v41 = vmul.f32 0.5, %v130_v39 }
 0x11e   :  { %v144_v48 = vmul.f32 %v297_v44, %v138_v43 }
 0x11f   :  { %v132_v42 = vsub.f32 1.5, %v131_v41 }
 0x120   :  { %v150_v51 = vadd.f32 %v298_v49, %v144_v48 }
 0x121   :  { %v133_v45 = vmul.f32 %v304_v36, %v132_v42 }
 0x123   :  { %v137_v46 = vsel %vm136_vm7, %v304_v36, %v133_v45 }
 0x124   :  { %v139_v47 = vmul.f32 %v137_v46, %v105_v18 }
 0x126   :  { %v145_v50 = vmul.f32 %v297_v44, %v139_v47 }
 0x128   :  { %v151_v52 = vadd.f32 %v298_v49, %v145_v50 }
 0x12a   :  { %v152_v53 = vpack.c.bf16 %v151_v52, %v150_v51 }
 0x12c   :  { %272 = vmatmul.msk.bf16.vlgmr.msra.gmra.mxu0 %vm88_vm0, %v152_v53  ;;  %281 = vmatmul.msk.bf16.vlgmr.msra.gmra.mxu1 %vm88_vm0, %v152_v53 }
 0x1a9   :  { %v181_v54 = vpop.f32.mrf.mxu0  ;;  %v216_v55 = vpop.f32.mrf.mxu1 }
 0x1aa   :  { %v186_v56 = vpack.c.bf16 %v181_v54, %v181_v54  ;;  %v221_v57 = vpack.c.bf16 %v216_v55, %v216_v55 }
 0x1ac   :  { %189 = vst.msk [vmem:[#allocation10] sm:$0xf] %vm188_vm8, %v186_v56 }
 0x1ad   :  { %223 = vst.msk [vmem:[#allocation11] sm:$0xf] %vm188_vm8, %v221_v57 }
 0x1b1   :  { %v183_v58 = vpop.f32.mrf.mxu0  ;;  %v218_v59 = vpop.f32.mrf.mxu1 }
 0x1b2   :  { %v187_v60 = vpack.c.bf16 %v183_v58, %v183_v58  ;;  %v222_v61 = vpack.c.bf16 %v218_v59, %v218_v59 }
 0x1b4   :  { %190 = vst.msk [vmem:[#allocation10 + $0x4] sm:$0xf] %vm188_vm8, %v187_v60 }
 0x1b5   :  { %224 = vst.msk [vmem:[#allocation11 + $0x4] sm:$0xf] %vm188_vm8, %v222_v61  ;;  %237 = dma.vmem_to_hbm [thread:$0]  %s230_s20, 128, %s232_s22, [#allocation4], %s464_s15, %s464_s15, %s465_s16  }
 0x1b6   :  { %250 = dma.vmem_to_hbm [thread:$0]  %s243_s24, 128, %s245_s27, [#allocation12], %s464_s15, %s464_s15, %s465_s16  }
 0x1b7   :  { %455 = dma.done.wait [#allocation4], 128  }
 0x1b8   :  { %456 = vsyncadd [#allocation4], 4294967168 }
 0x1b9   :  { %457 = dma.done.wait [#allocation12], 128  }
 0x1ba   :  { %458 = vsyncadd [#allocation12], 4294967168 }
 0x1bb   :  { %259 = vsyncpa [#allocation3], 1 }
 0x1bc   :  { %260 = vsyncpa [#allocation6], 1 }
 0x1bd   :  { %261 = vsyncpa [#allocation9], 1 }
 0x1be   :  { %262 = vsyncpa [#allocation4], 1 }
 0x1bf   :  { %263 = vsyncpa [#allocation12], 1 }

</bundles_post_ra>
